<compile_context>
chip_gen: v7x
topology: tpu7x:2x2x1
jax: 0.10.0
libtpu: 0.0.40
codegen_flags: <defaults>
</compile_context>

<pallas_src>
import jax
import jax.numpy as jnp
from jax.experimental import pallas as pl
from jax.experimental.pallas import tpu as pltpu


def _round_up(x, m):
    return ((x + m - 1) // m) * m


# ----------------------------- Pallas kernel ------------------------------ #

def _fuse4_bias_relu_kernel(g_ss, g_se, g_es, g_ee, b_ref, o_ref):
    # out = relu(g_ss + g_se + g_es + g_ee + b), accumulated in f32 on the VPU.
    acc = g_ss[...].astype(jnp.float32) + g_se[...].astype(jnp.float32)
    acc = acc + g_es[...].astype(jnp.float32) + g_ee[...].astype(jnp.float32)
    acc = acc + b_ref[...]                      # (tm, H) + (1, H) broadcast
    o_ref[...] = jnp.maximum(acc, 0.0).astype(o_ref.dtype)


def fuse_rel_pos(g_ss, g_se, g_es, g_ee, b, *, tm_target=1024,
                 out_dtype=jnp.float32):
    """g_*: [M, H] gathered z-rows (bf16/f32), b: [H] f32 -> [M, H] out_dtype.

    Streaming, memory-bound kernel: 4 input slabs in, 1 output slab out.
    No M/N padding (ragged last block handled by Pallas; output last dim is
    the full H so stores never write garbage columns).
    """
    M, H = g_ss.shape
    for g in (g_se, g_es, g_ee):
        assert g.shape == (M, H)
    b2 = jnp.asarray(b, jnp.float32).reshape(1, H)

    # Row tile: aim for >= ~8 grid steps (keeps v7x's 2 TensorCores busy via
    # the "parallel" grid axis) but never smaller than 8 rows (sublane align)
    # and never larger than tm_target.
    if M <= 8:
        tm = M                                   # block dim == full array dim
    else:
        tm = max(8, min(int(tm_target), _round_up(pl.cdiv(M, 8), 8)))

    in_b = jnp.dtype(g_ss.dtype).itemsize
    out_b = jnp.dtype(out_dtype).itemsize
    # Double-buffered streaming operands + resident bias.
    per_step = tm * H * (4 * in_b + out_b)
    vmem_est = 2 * per_step + H * 4
    VMEM_CAP = 40 << 20                          # headroom under v7x's 64 MiB
    while vmem_est > VMEM_CAP and tm > 8:
        tm = max(8, (tm // 2) // 8 * 8)
        per_step = tm * H * (4 * in_b + out_b)
        vmem_est = 2 * per_step + H * 4
    vmem_limit = int(min(max(2 * vmem_est, 16 << 20), 48 << 20))

    grid_m = pl.cdiv(M, tm)

    cost = pl.CostEstimate(
        flops=5 * M * H,
        transcendentals=0,
        bytes_accessed=M * H * (4 * in_b + out_b) + H * 4,
    )

    g_spec = pl.BlockSpec((tm, H), lambda i: (i, 0))
    b_spec = pl.BlockSpec((1, H), lambda i: (0, 0))      # resident across grid

    out = pl.pallas_call(
        _fuse4_bias_relu_kernel,
        out_shape=jax.ShapeDtypeStruct((M, H), out_dtype),
        grid_spec=pltpu.PrefetchScalarGridSpec(
            num_scalar_prefetch=0,
            grid=(grid_m,),
            in_specs=[g_spec, g_spec, g_spec, g_spec, b_spec],
            out_specs=pl.BlockSpec((tm, H), lambda i: (i, 0)),
        ),
        compiler_params=pltpu.CompilerParams(
            dimension_semantics=("parallel",),
            vmem_limit_bytes=vmem_limit),
        cost_estimate=cost,
    )(g_ss, g_se, g_es, g_ee, b2)
    return out


# --------------------------- Module (JAX glue) ----------------------------- #

def char_lex_len_to_mask(seq_len, lex_num, max_char_len, max_word_len):
    # NOTE: helper is not shown in the torch source; standard FLAT semantics
    # assumed: lattice token t is valid iff t < seq_len + lex_num, and
    # mask[b, i, j] = valid[b, i] & valid[b, j].
    total = seq_len + lex_num                                    # [B]
    vc = jnp.arange(max_char_len)[None, :] < total[:, None]      # [B, Lc]
    vw = jnp.arange(max_word_len)[None, :] < total[:, None]      # [B, Lw]
    return vc[:, :, None] & vw[:, None, :]                       # [B, Lc, Lw]


class FourPosFusionEmbedding:
    """'ff' fusion: rel_pos_embedding = ReLU(Linear(cat([pe_ss,pe_se,pe_es,pe_ee])))."""

    def __init__(self, pe_ss, pe_se, pe_es, pe_ee, w, b, hidden_size, *,
                 param_dtype=jnp.bfloat16, out_dtype=jnp.float32, tm=1024):
        H = hidden_size
        w32 = jnp.asarray(w, jnp.float32)            # [4H, H] (= torch weight.T)
        assert w32.shape == (4 * H, H)
        pes = [jnp.asarray(p, jnp.float32) for p in (pe_ss, pe_se, pe_es, pe_ee)]
        # Exact algebraic refactor done once at init (f32 matmul, then stored
        # in param_dtype): z_k = pe_k @ W_k, so the per-call path is only
        # gather + add + bias + ReLU.  bf16 z halves gathered-slab HBM traffic.
        self.z = tuple((pes[k] @ w32[k * H:(k + 1) * H]).astype(param_dtype)
                       for k in range(4))
        self.b = jnp.asarray(b, jnp.float32)         # [H]
        self.hidden_size = H
        self.out_dtype = out_dtype
        self.tm = tm

    def _rel_indices(self, seq_len, lex_num, pos_s, pos_e, lex_s, lex_e):
        B, Lc = pos_s.shape
        _, Lw = lex_s.shape
        mask = char_lex_len_to_mask(seq_len, lex_num, Lc, Lw)    # [B, Lc, Lw]

        pos_ss = pos_s[:, :, None] - lex_s[:, None, :]
        pos_se = pos_s[:, :, None] - lex_e[:, None, :]
        pos_es = pos_e[:, :, None] - lex_s[:, None, :]
        pos_ee = pos_e[:, :, None] - lex_e[:, None, :]

        # Matches the torch module: only pos_ss / pos_ee are masked & zeroed.
        pos_ss = jnp.where(mask, pos_ss, 510)
        pos_ee = jnp.where(mask, pos_ee, 510)
        pos_ss = pos_ss.at[:, :, 0].set(0)
        pos_ee = pos_ee.at[:, :, 0].set(0)
        return pos_ss, pos_se, pos_es, pos_ee

    def __call__(self, seq_len, lex_num, pos_s, pos_e, lex_s=None, lex_e=None):
        if lex_s is None or lex_e is None:
            lex_s, lex_e = pos_s, pos_e
        B, Lc = pos_s.shape
        _, Lw = lex_s.shape
        H = self.hidden_size

        idx4 = self._rel_indices(seq_len, lex_num, pos_s, pos_e, lex_s, lex_e)

        # torch advanced indexing wraps negative indices -> emulate with mod.
        # TODO(synk): upstream FLAT variants sometimes index pe[pos + max_seq_len];
        # verify wrap-vs-offset against the real char_lex_len_to_mask / pe setup.
        g = tuple(z[jnp.mod(i.reshape(-1), z.shape[0])]          # [M, H] each
                  for z, i in zip(self.z, idx4))

        out = fuse_rel_pos(*g, self.b, tm_target=self.tm,
                           out_dtype=self.out_dtype)             # [M, H]
        return out.reshape(B, Lc, Lw, H)


# --------------------------------- main ------------------------------------ #

if __name__ == "__main__":
    key = jax.random.PRNGKey(0)
    k_ss, k_se, k_es, k_ee, k_w, k_b, k_span = jax.random.split(key, 7)

    batch, L, hidden = 2, 8, 32
    max_seq_len = 512                      # fill value 510 must be a valid index
    table_size = 2 * max_seq_len + 1       # 1025

    # Deterministic synthetic parameters.
    pe_ss = jax.random.normal(k_ss, (table_size, hidden), jnp.float32) * 0.1
    pe_se = jax.random.normal(k_se, (table_size, hidden), jnp.float32) * 0.1
    pe_es = jax.random.normal(k_es, (table_size, hidden), jnp.float32) * 0.1
    pe_ee = jax.random.normal(k_ee, (table_size, hidden), jnp.float32) * 0.1
    w = jax.random.normal(k_w, (4 * hidden, hidden), jnp.float32) * 0.05
    b = jax.random.normal(k_b, (hidden,), jnp.float32) * 0.05

    # Deterministic synthetic inputs.
    pos_s = jnp.tile(jnp.arange(L, dtype=jnp.int32), (batch, 1))
    span = jax.random.randint(k_span, (batch, L), 0, 4, dtype=jnp.int32)
    pos_e = pos_s + span
    seq_len = jnp.array([6, 5], dtype=jnp.int32)
    lex_num = jnp.array([2, 3], dtype=jnp.int32)

    # Full-precision instance (exact algebra vs the torch f32 module, modulo
    # matmul accumulation order).
    mod_f32 = FourPosFusionEmbedding(pe_ss, pe_se, pe_es, pe_ee, w, b, hidden,
                                     param_dtype=jnp.float32)
    out_f32 = jax.block_until_ready(mod_f32(seq_len, lex_num, pos_s, pos_e))
    assert out_f32.shape == (batch, L, L, hidden)
    assert out_f32.dtype == jnp.float32

    # Pure-JAX torch-equivalent reference: relu(cat(pe_k[idx_k]) @ W + b).
    idx4 = mod_f32._rel_indices(seq_len, lex_num, pos_s, pos_e, pos_s, pos_e)
    tables = (pe_ss, pe_se, pe_es, pe_ee)
    pe_4 = jnp.concatenate(
        [t[jnp.mod(i.reshape(-1), t.shape[0])] for t, i in zip(tables, idx4)],
        axis=-1)                                                  # [M, 4H]
    ref = jnp.maximum(pe_4 @ w + b, 0.0).reshape(batch, L, L, hidden)

    assert jnp.allclose(out_f32, ref, atol=2e-3, rtol=2e-3)

    # Default (bf16 z-tables) production config: same semantics, bf16 rounding.
    mod_bf16 = FourPosFusionEmbedding(pe_ss, pe_se, pe_es, pe_ee, w, b, hidden)
    out_bf16 = jax.block_until_ready(mod_bf16(seq_len, lex_num, pos_s, pos_e))
    assert out_bf16.shape == (batch, L, L, hidden)
    assert jnp.allclose(out_bf16, ref, atol=5e-3, rtol=5e-3)

    print("KERNEL_OK")
</pallas_src>

<mosaic_0001>
module attributes {stable_mosaic.version = 11 : i64} {
  func.func @_fuse4_bias_relu_kernel(%arg0: i32, %arg1: memref<16x32xf32, #tpu.memory_space<vmem>>, %arg2: memref<16x32xf32, #tpu.memory_space<vmem>>, %arg3: memref<16x32xf32, #tpu.memory_space<vmem>>, %arg4: memref<16x32xf32, #tpu.memory_space<vmem>>, %arg5: memref<1x32xf32, #tpu.memory_space<vmem>>, %arg6: memref<16x32xf32, #tpu.memory_space<vmem>>) attributes {dimension_semantics = [#tpu.dimension_semantics<parallel>], iteration_bounds = array<i64: 8>, scalar_prefetch = 0 : i64, scratch_operands = 0 : i64, tpu.core_type = #tpu.core_type<tc>, window_params = [{transform_indices = @transform_0, window_bounds = array<i64: 16, 32>}, {transform_indices = @transform_1, window_bounds = array<i64: 16, 32>}, {transform_indices = @transform_2, window_bounds = array<i64: 16, 32>}, {transform_indices = @transform_3, window_bounds = array<i64: 16, 32>}, {pipeline_mode = #tpu.pipeline_mode<synchronous>, transform_indices = @transform_4, window_bounds = array<i64: 1, 32>}, {transform_indices = @transform_5, window_bounds = array<i64: 16, 32>}]} {
    %c0 = arith.constant 0 : index
    %c0_0 = arith.constant 0 : index
    %0 = vector.load %arg1[%c0, %c0_0] : memref<16x32xf32, #tpu.memory_space<vmem>>, vector<16x32xf32>
    %c0_1 = arith.constant 0 : index
    %c0_2 = arith.constant 0 : index
    %1 = vector.load %arg2[%c0_1, %c0_2] : memref<16x32xf32, #tpu.memory_space<vmem>>, vector<16x32xf32>
    %2 = arith.addf %0, %1 : vector<16x32xf32>
    %c0_3 = arith.constant 0 : index
    %c0_4 = arith.constant 0 : index
    %3 = vector.load %arg3[%c0_3, %c0_4] : memref<16x32xf32, #tpu.memory_space<vmem>>, vector<16x32xf32>
    %4 = arith.addf %2, %3 : vector<16x32xf32>
    %c0_5 = arith.constant 0 : index
    %c0_6 = arith.constant 0 : index
    %5 = vector.load %arg4[%c0_5, %c0_6] : memref<16x32xf32, #tpu.memory_space<vmem>>, vector<16x32xf32>
    %6 = arith.addf %4, %5 : vector<16x32xf32>
    %c0_7 = arith.constant 0 : index
    %c0_8 = arith.constant 0 : index
    %7 = vector.load %arg5[%c0_7, %c0_8] : memref<1x32xf32, #tpu.memory_space<vmem>>, vector<1x32xf32>
    %8 = vector.broadcast %7 : vector<1x32xf32> to vector<16x32xf32>
    %9 = arith.addf %6, %8 : vector<16x32xf32>
    %cst = arith.constant 0.000000e+00 : f32
    %10 = vector.broadcast %cst : f32 to vector<16x32xf32>
    %11 = arith.maximumf %9, %10 : vector<16x32xf32>
    %c0_9 = arith.constant 0 : index
    %c0_10 = arith.constant 0 : index
    %12 = vector.load %arg6[%c0_9, %c0_10] : memref<16x32xf32, #tpu.memory_space<vmem>>, vector<16x32xf32>
    tpu.vector_store %arg6[%c0_9, %c0_10], %11 {strides = array<i32>} : memref<16x32xf32, #tpu.memory_space<vmem>>, vector<16x32xf32>,
    return
  }
  func.func @transform_0(%arg0: i32) -> (i32, i32) {
    %c0_i32 = arith.constant 0 : i32
    %c0_i32_0 = arith.constant 0 : i32
    return %arg0, %c0_i32 : i32, i32
  }
  func.func @transform_1(%arg0: i32) -> (i32, i32) {
    %c0_i32 = arith.constant 0 : i32
    %c0_i32_0 = arith.constant 0 : i32
    return %arg0, %c0_i32 : i32, i32
  }
  func.func @transform_2(%arg0: i32) -> (i32, i32) {
    %c0_i32 = arith.constant 0 : i32
    %c0_i32_0 = arith.constant 0 : i32
    return %arg0, %c0_i32 : i32, i32
  }
  func.func @transform_3(%arg0: i32) -> (i32, i32) {
    %c0_i32 = arith.constant 0 : i32
    %c0_i32_0 = arith.constant 0 : i32
    return %arg0, %c0_i32 : i32, i32
  }
  func.func @transform_4(%arg0: i32) -> (i32, i32) {
    %c0_i32 = arith.constant 0 : i32
    %c0_i32_0 = arith.constant 0 : i32
    %c0_i32_1 = arith.constant 0 : i32
    return %c0_i32, %c0_i32_0 : i32, i32
  }
  func.func @transform_5(%arg0: i32) -> (i32, i32) {
    %c0_i32 = arith.constant 0 : i32
    %c0_i32_0 = arith.constant 0 : i32
    return %arg0, %c0_i32 : i32, i32
  }
}

</mosaic_0001>

<bundles_post_ra>
// kernel: tpu_custom_call.1
= control target key start
LH: loop header
LB: loop body
LE: loop exit
PB: predicated region body
PF: predicated region fallthrough
CT: control target
= control target key end

     0   :  { %s478_s18 = smov 0   ;;  %s507_s0 = inlined_call_operand.vmem [shape: f32[128,32], index: 0, kind: input, shape index: {}]   ;;  %s508_s1 = inlined_call_operand.vmem [shape: f32[128,32], index: 1, kind: input, shape index: {}]   ;;  %s509_s2 = inlined_call_operand.vmem [shape: f32[128,32], index: 2, kind: input, shape index: {}]   ;;  %s510_s3 = inlined_call_operand.vmem [shape: f32[128,32], index: 3, kind: input, shape index: {}]   ;;  %s511_s4 = inlined_call_operand.vmem [shape: f32[1,32], index: 4, kind: input, shape index: {}]   ;;  %s512_s5 = inlined_call_operand.vmem [shape: f32[128,32], index: 5, kind: output, shape index: {}]  }
   0x1 LB: > { %s414_s19 = sadd.s32 4294967295, %s446_s18   ;;  %p418_p0 = scmp.ge.s32.totalorder %s446_s18, 1  ;;  %s446_s18 = sphi %s478_s18, %s15_s18  }
   0x2   : > { %p221_p1 = scmp.lt.s32.totalorder %s446_s18, 9 }
   0x4   : > { %p222_p2 = pnand %p418_p0, %p221_p1 }
   0x5   : > { %s419_s20 = sshll.u32 (!%p222_p2), %s414_s19, 1  ;;  %v429_v11 = vld [vmem:[%s511_s4] ss:$0 sm:$0xff] (!%p222_p2)  ;;  %vm319_vm0 = vcmask (!%p222_p2), 261120  }
   0x6   : > { %225 = sbr.rel (%p222_p2) target bundleno = 29 (0x1d), region = 40  ;;  %p265_p3 = scmp.lt.s32.totalorder (!%p222_p2), %s419_s20, 15 }
   0xd   : > { %s514_s20 = smov (!%p265_p3, %s419_s20), 15 }
   0xe   : > { %s420_s21 = sshll.u32 %s514_s20, 3 }
   0xf   : > { %s268_s24 = scalar_lea.vmem %s507_s0, %s420_s21  ;;  %s274_s27 = scalar_lea.vmem %s508_s1, %s420_s21 }
  0x10   : > { %s280_s30 = scalar_lea.vmem %s509_s2, %s420_s21  ;;  %s286_s8 = scalar_lea.vmem %s510_s3, %s420_s21  ;;  %v294_v0 = vld [vmem:[%s268_s24] sm:$0xff]  ;;  %v295_v2 = vld [vmem:[%s268_s24 + $0x8] sm:$0xff] }
  0x11   : > { %v296_v1 = vld [vmem:[%s274_s27] sm:$0xff]  ;;  %v297_v5 = vld [vmem:[%s274_s27 + $0x8] sm:$0xff]  ;;  %s292_s13 = scalar_lea.vmem %s512_s5, %s420_s21 }
  0x12   : > { %v298_v3 = vadd.f32 %v296_v1, %v294_v0  ;;  %v300_v4 = vld [vmem:[%s280_s30] sm:$0xff]  ;;  %v299_v7 = vadd.f32 %v297_v5, %v295_v2  ;;  %v301_v8 = vld [vmem:[%s280_s30 + $0x8] sm:$0xff] }
  0x13   : > { %v304_v6 = vld [vmem:[%s286_s8] sm:$0xff]  ;;  %v305_v10 = vld [vmem:[%s286_s8 + $0x8] sm:$0xff] }
  0x14   : > { %v302_v9 = vadd.f32 %v300_v4, %v298_v3  ;;  %v303_v12 = vadd.f32 %v301_v8, %v299_v7 }
  0x16   : > { %v306_v13 = vadd.f32 %v304_v6, %v302_v9  ;;  %v307_v14 = vadd.f32 %v305_v10, %v303_v12 }
  0x18   : > { %v315_v15 = vadd.f32 %v429_v11, %v306_v13  ;;  %v316_v16 = vadd.f32 %v429_v11, %v307_v14 }
  0x1a   : > { %v317_v17 = vmax.f32 %v315_v15, 0.0  ;;  %v318_v18 = vmax.f32 %v316_v16, 0.0 }
  0x1c   : > { %320 = vst.msk [vmem:[%s292_s13] sm:$0xff] %vm319_vm0, %v317_v17  ;;  %321 = vst.msk [vmem:[%s292_s13 + $0x8] sm:$0xff] %vm319_vm0, %v318_v18 }
  0x1d PF: > { %s15_s18 = sadd.s32 1, %s446_s18  }
  0x1e   : > { %p12_p4 = scmp.ge.s32.totalorder %s15_s18, 10  }
  0x20   :  { %14 = sbr.rel (!%p12_p4) target bundleno = 1 (0x1), region = 79 }

</bundles_post_ra>
